<compile_context>
chip_gen: v6e
topology: v6e:2x2x1
jax: 0.10.0
libtpu: 0.0.40
codegen_flags: <defaults>
</compile_context>

<pallas_src>
import jax
import jax.numpy as jnp
from jax.experimental import pallas as pl
from jax.experimental.pallas import tpu as pltpu


def _round_up(n, m=128):
    return max(m, ((n + m - 1) // m) * m)


def elman_seq_kernel(xproj_ref, h0_ref, whh_ref, wo_ref, bo_ref,
                     out_ref, hfinal_ref, h_scratch):
    """One grid step = one Elman recurrence step t.

    xproj_ref : (1, 1, Hp)  precomputed x_t @ W_hx + b_h   (new tile each step)
    h0_ref    : (1, Hp)     initial hidden state           (resident)
    whh_ref   : (Hp, Hp)    hidden->hidden weight          (resident)
    wo_ref    : (Hp, Op)    hidden->output weight          (resident)
    bo_ref    : (1, Op)     output bias                    (resident)
    out_ref   : (1, 1, Op)  per-step output
    hfinal_ref: (1, Hp)     final hidden (written at t == T-1)
    h_scratch : (1, Hp)     VMEM carry of the hidden state across grid steps
    """
    t = pl.program_id(0)

    @pl.when(t == 0)
    def _():
        h_scratch[...] = h0_ref[...]

    pre = xproj_ref[0] + jnp.dot(h_scratch[...], whh_ref[...],
                                 preferred_element_type=jnp.float32)
    h_new = jnp.tanh(pre)                               # hidden_activation = tanh (EUP)
    h_scratch[...] = h_new

    out = jnp.dot(h_new, wo_ref[...],
                  preferred_element_type=jnp.float32) + bo_ref[...]
    out_ref[0] = out.astype(out_ref.dtype)              # output_activation = identity

    @pl.when(t == pl.num_programs(0) - 1)
    def _():
        hfinal_ref[...] = h_new.astype(hfinal_ref.dtype)


@jax.jit
def elman_rollout(xs, h0, w_h, b_h, w_o, b_o):
    """T sequential ElmanNetwork.forward calls fused into one Pallas kernel.

    xs  : (T, *input_shape)  -- each step uses xs[t].reshape(-1)  (x.view(-1))
    h0  : (H,)               -- initial hidden state (self.reset())
    w_h : (H, input_size+H)  -- hidden_layer.weight (PyTorch layout)
    b_h : (H,)               -- hidden_layer.bias
    w_o : (O, H)             -- output_layer.weight
    b_o : (O,)               -- output_layer.bias
    returns (outputs (T, O), final_hidden (H,))
    """
    T = xs.shape[0]
    f32 = jnp.float32
    x_flat = xs.reshape(T, -1).astype(f32)
    input_size = x_flat.shape[1]
    H = h0.shape[-1]
    O = b_o.shape[-1]
    Hp = _round_up(H)
    Op = _round_up(O)

    # Split the concatenated-input weight once; transpose to (in, out) layout.
    w_h32 = w_h.astype(f32)
    w_hx = w_h32[:, :input_size].T                    # (input_size, H)
    w_hh = w_h32[:, input_size:].T                    # (H, H)
    w_ot = w_o.astype(f32).T                          # (H, O)

    # Input projection for all timesteps: one tall matmul outside the recurrence.
    xproj = x_flat @ w_hx + b_h.astype(f32)           # (T, H)

    # Pad hidden/output lanes up to 128 for lane-dense tiles.
    xproj_p = jnp.pad(xproj, ((0, 0), (0, Hp - H)))[:, None, :]            # (T,1,Hp)
    h0_p = jnp.pad(h0.reshape(1, H).astype(f32), ((0, 0), (0, Hp - H)))    # (1,Hp)
    whh_p = jnp.pad(w_hh, ((0, Hp - H), (0, Hp - H)))                      # (Hp,Hp)
    wo_p = jnp.pad(w_ot, ((0, Hp - H), (0, Op - O)))                       # (Hp,Op)
    bo_p = jnp.pad(b_o.reshape(1, O).astype(f32), ((0, 0), (0, Op - O)))   # (1,Op)

    const2d = lambda shape: pl.BlockSpec(shape, lambda t: (0, 0))

    out_seq, h_final = pl.pallas_call(
        elman_seq_kernel,
        out_shape=(jax.ShapeDtypeStruct((T, 1, Op), f32),
                   jax.ShapeDtypeStruct((1, Hp), f32)),
        grid_spec=pltpu.PrefetchScalarGridSpec(
            num_scalar_prefetch=0,
            grid=(T,),
            in_specs=[
                pl.BlockSpec((1, 1, Hp), lambda t: (t, 0, 0)),   # xproj (per step)
                const2d((1, Hp)),                                # h0     (resident)
                const2d((Hp, Hp)),                               # W_hh   (resident)
                const2d((Hp, Op)),                               # W_o    (resident)
                const2d((1, Op)),                                # b_o    (resident)
            ],
            out_specs=(
                pl.BlockSpec((1, 1, Op), lambda t: (t, 0, 0)),   # per-step output
                const2d((1, Hp)),                                # final hidden
            ),
            scratch_shapes=[pltpu.VMEM((1, Hp), f32)],           # hidden carry
        ),
        compiler_params=pltpu.CompilerParams(
            dimension_semantics=("arbitrary",)),                 # serial recurrence
    )(xproj_p, h0_p, whh_p, wo_p, bo_p)

    return out_seq[:, 0, :O], h_final[0, :H]


if __name__ == "__main__":
    key = jax.random.PRNGKey(0)
    # Small shapes consistent with the module: each forward() flattens x to
    # input_size; T sequential forward() calls form the roll-out.
    B, C, S = 2, 4, 16
    T = 8
    input_size = B * C * S          # 128
    H, O = 32, 8                    # config.hidden_sizes = [32], output_size = 8

    k0, k1, k2, k3, k4 = jax.random.split(key, 5)
    xs  = jax.random.normal(k0, (T, B, C, S), jnp.float32)
    w_h = jax.random.normal(k1, (H, input_size + H), jnp.float32) * 0.05
    b_h = jax.random.normal(k2, (H,), jnp.float32) * 0.05
    w_o = jax.random.normal(k3, (O, H), jnp.float32) * 0.05
    b_o = jax.random.normal(k4, (O,), jnp.float32) * 0.05
    h0  = jnp.zeros((H,), jnp.float32)   # self.reset()

    out_seq, h_final = elman_rollout(xs, h0, w_h, b_h, w_o, b_o)
    out_seq, h_final = jax.block_until_ready((out_seq, h_final))

    # Pure-JAX reference: T sequential steps with exact PyTorch semantics.
    h = h0
    outs = []
    for t in range(T):
        total_input = jnp.concatenate([xs[t].reshape(-1), h])
        h = jnp.tanh(total_input @ w_h.T + b_h)
        outs.append(h @ w_o.T + b_o)
    out_ref = jnp.stack(outs)

    assert jnp.allclose(out_seq, out_ref, atol=1e-4), "output mismatch"
    assert jnp.allclose(h_final, h, atol=1e-4), "hidden mismatch"

    print("KERNEL_OK")
</pallas_src>

<mosaic_0001>
module attributes {stable_mosaic.version = 11 : i64} {
  func.func @elman_seq_kernel(%arg0: i32, %arg1: memref<1x1x128xf32, #tpu.memory_space<vmem>>, %arg2: memref<1x128xf32, #tpu.memory_space<vmem>>, %arg3: memref<128x128xf32, #tpu.memory_space<vmem>>, %arg4: memref<128x128xf32, #tpu.memory_space<vmem>>, %arg5: memref<1x128xf32, #tpu.memory_space<vmem>>, %arg6: memref<1x1x128xf32, #tpu.memory_space<vmem>>, %arg7: memref<1x128xf32, #tpu.memory_space<vmem>>, %arg8: memref<1x128xf32, #tpu.memory_space<vmem>>) attributes {dimension_semantics = [#tpu.dimension_semantics<arbitrary>], iteration_bounds = array<i64: 8>, scalar_prefetch = 0 : i64, scratch_operands = 1 : i64, tpu.core_type = #tpu.core_type<tc>, window_params = [{transform_indices = @transform_0, window_bounds = array<i64: 1, 1, 128>}, {pipeline_mode = #tpu.pipeline_mode<synchronous>, transform_indices = @transform_1, window_bounds = array<i64: 1, 128>}, {pipeline_mode = #tpu.pipeline_mode<synchronous>, transform_indices = @transform_2, window_bounds = array<i64: 128, 128>}, {pipeline_mode = #tpu.pipeline_mode<synchronous>, transform_indices = @transform_3, window_bounds = array<i64: 128, 128>}, {pipeline_mode = #tpu.pipeline_mode<synchronous>, transform_indices = @transform_4, window_bounds = array<i64: 1, 128>}, {transform_indices = @transform_5, window_bounds = array<i64: 1, 1, 128>}, {pipeline_mode = #tpu.pipeline_mode<synchronous>, transform_indices = @transform_6, window_bounds = array<i64: 1, 128>}]} {
    %c0_i32 = arith.constant 0 : i32
    %0 = arith.cmpi eq, %arg0, %c0_i32 : i32
    %1 = arith.extui %0 : i1 to i32
    %c0_i32_0 = arith.constant 0 : i32
    %2 = arith.cmpi ne, %1, %c0_i32_0 : i32
    scf.if %2 {
      %c0_18 = arith.constant 0 : index
      %c0_19 = arith.constant 0 : index
      %21 = vector.load %arg2[%c0_18, %c0_19] : memref<1x128xf32, #tpu.memory_space<vmem>>, vector<1x128xf32>
      %c0_20 = arith.constant 0 : index
      %c0_21 = arith.constant 0 : index
      %22 = vector.load %arg8[%c0_20, %c0_21] : memref<1x128xf32, #tpu.memory_space<vmem>>, vector<1x128xf32>
      tpu.vector_store %arg8[%c0_20, %c0_21], %21 {strides = array<i32>} : memref<1x128xf32, #tpu.memory_space<vmem>>, vector<1x128xf32>,
    } else {
    }
    %c0 = arith.constant 0 : index
    %c0_1 = arith.constant 0 : index
    %c0_2 = arith.constant 0 : index
    %3 = vector.load %arg1[%c0, %c0_1, %c0_2] : memref<1x1x128xf32, #tpu.memory_space<vmem>>, vector<1x1x128xf32>
    %4 = vector.shape_cast %3 : vector<1x1x128xf32> to vector<1x128xf32>
    %c0_3 = arith.constant 0 : index
    %c0_4 = arith.constant 0 : index
    %5 = vector.load %arg8[%c0_3, %c0_4] : memref<1x128xf32, #tpu.memory_space<vmem>>, vector<1x128xf32>
    %c0_5 = arith.constant 0 : index
    %c0_6 = arith.constant 0 : index
    %6 = vector.load %arg3[%c0_5, %c0_6] : memref<128x128xf32, #tpu.memory_space<vmem>>, vector<128x128xf32>
    %cst = arith.constant dense<0.000000e+00> : vector<1x128xf32>
    %7 = tpu.matmul %5, %6, %cst {dimension_numbers = #tpu.dot_dimension_numbers<[1], [0], [0], [1], [0, 0, 1, 1], [], []>} : vector<1x128xf32>, vector<128x128xf32>, vector<1x128xf32> -> vector<1x128xf32>
    %8 = arith.addf %4, %7 : vector<1x128xf32>
    %9 = math.tanh %8 : vector<1x128xf32>
    %c0_7 = arith.constant 0 : index
    %c0_8 = arith.constant 0 : index
    %10 = vector.load %arg8[%c0_7, %c0_8] : memref<1x128xf32, #tpu.memory_space<vmem>>, vector<1x128xf32>
    tpu.vector_store %arg8[%c0_7, %c0_8], %9 {strides = array<i32>} : memref<1x128xf32, #tpu.memory_space<vmem>>, vector<1x128xf32>,
    %c0_9 = arith.constant 0 : index
    %c0_10 = arith.constant 0 : index
    %11 = vector.load %arg4[%c0_9, %c0_10] : memref<128x128xf32, #tpu.memory_space<vmem>>, vector<128x128xf32>
    %cst_11 = arith.constant dense<0.000000e+00> : vector<1x128xf32>
    %12 = tpu.matmul %9, %11, %cst_11 {dimension_numbers = #tpu.dot_dimension_numbers<[1], [0], [0], [1], [0, 0, 1, 1], [], []>} : vector<1x128xf32>, vector<128x128xf32>, vector<1x128xf32> -> vector<1x128xf32>
    %c0_12 = arith.constant 0 : index
    %c0_13 = arith.constant 0 : index
    %13 = vector.load %arg5[%c0_12, %c0_13] : memref<1x128xf32, #tpu.memory_space<vmem>>, vector<1x128xf32>
    %14 = arith.addf %12, %13 : vector<1x128xf32>
    %c0_14 = arith.constant 0 : index
    %c0_15 = arith.constant 0 : index
    %c0_16 = arith.constant 0 : index
    %15 = vector.load %arg6[%c0_14, %c0_15, %c0_16] : memref<1x1x128xf32, #tpu.memory_space<vmem>>, vector<1x1x128xf32>
    %16 = vector.shape_cast %15 : vector<1x1x128xf32> to vector<1x128xf32>
    %17 = vector.shape_cast %14 : vector<1x128xf32> to vector<1x1x128xf32>
    tpu.vector_store %arg6[%c0_14, %c0_15, %c0_16], %17 {strides = array<i32>} : memref<1x1x128xf32, #tpu.memory_space<vmem>>, vector<1x1x128xf32>,
    %c7_i32 = arith.constant 7 : i32
    %18 = arith.cmpi eq, %arg0, %c7_i32 : i32
    %19 = arith.extui %18 : i1 to i32
    %c0_i32_17 = arith.constant 0 : i32
    %20 = arith.cmpi ne, %19, %c0_i32_17 : i32
    scf.if %20 {
      %c0_18 = arith.constant 0 : index
      %c0_19 = arith.constant 0 : index
      %21 = vector.load %arg7[%c0_18, %c0_19] : memref<1x128xf32, #tpu.memory_space<vmem>>, vector<1x128xf32>
      tpu.vector_store %arg7[%c0_18, %c0_19], %9 {strides = array<i32>} : memref<1x128xf32, #tpu.memory_space<vmem>>, vector<1x128xf32>,
    } else {
    }
    return
  }
  func.func @transform_0(%arg0: i32) -> (i32, i32, i32) {
    %c0_i32 = arith.constant 0 : i32
    %c0_i32_0 = arith.constant 0 : i32
    %c0_i32_1 = arith.constant 0 : i32
    return %arg0, %c0_i32, %c0_i32_0 : i32, i32, i32
  }
  func.func @transform_1(%arg0: i32) -> (i32, i32) {
    %c0_i32 = arith.constant 0 : i32
    %c0_i32_0 = arith.constant 0 : i32
    %c0_i32_1 = arith.constant 0 : i32
    return %c0_i32, %c0_i32_0 : i32, i32
  }
  func.func @transform_2(%arg0: i32) -> (i32, i32) {
    %c0_i32 = arith.constant 0 : i32
    %c0_i32_0 = arith.constant 0 : i32
    %c0_i32_1 = arith.constant 0 : i32
    return %c0_i32, %c0_i32_0 : i32, i32
  }
  func.func @transform_3(%arg0: i32) -> (i32, i32) {
    %c0_i32 = arith.constant 0 : i32
    %c0_i32_0 = arith.constant 0 : i32
    %c0_i32_1 = arith.constant 0 : i32
    return %c0_i32, %c0_i32_0 : i32, i32
  }
  func.func @transform_4(%arg0: i32) -> (i32, i32) {
    %c0_i32 = arith.constant 0 : i32
    %c0_i32_0 = arith.constant 0 : i32
    %c0_i32_1 = arith.constant 0 : i32
    return %c0_i32, %c0_i32_0 : i32, i32
  }
  func.func @transform_5(%arg0: i32) -> (i32, i32, i32) {
    %c0_i32 = arith.constant 0 : i32
    %c0_i32_0 = arith.constant 0 : i32
    %c0_i32_1 = arith.constant 0 : i32
    return %arg0, %c0_i32, %c0_i32_0 : i32, i32, i32
  }
  func.func @transform_6(%arg0: i32) -> (i32, i32) {
    %c0_i32 = arith.constant 0 : i32
    %c0_i32_0 = arith.constant 0 : i32
    %c0_i32_1 = arith.constant 0 : i32
    return %c0_i32, %c0_i32_0 : i32, i32
  }
}

</mosaic_0001>

<bundles_post_ra>
// kernel: elman_rollout.1
= control target key start
LH: loop header
LB: loop body
LE: loop exit
PB: predicated region body
PF: predicated region fallthrough
CT: control target
= control target key end

     0   :  { %12 = vsyncpa [#allocation4], 0  ;;  %s1002_s0 = inlined_call_operand.vmem [shape: f32[8,1,128], index: 0, kind: input, shape index: {}]   ;;  %s1003_s1 = inlined_call_operand.vmem [shape: f32[1,128], index: 1, kind: input, shape index: {}]   ;;  %s1004_s2 = inlined_call_operand.vmem [shape: f32[128,128], index: 2, kind: input, shape index: {}]   ;;  %s1005_s3 = inlined_call_operand.vmem [shape: f32[128,128], index: 3, kind: input, shape index: {}]   ;;  %s1006_s4 = inlined_call_operand.vmem [shape: f32[1,128], index: 4, kind: input, shape index: {}]   ;;  %s1007_s5 = inlined_call_operand.hbm [shape: f32[8,1,128], index: 5, kind: output, shape index: {0}]   ;;  %s1008_s6 = inlined_call_operand.vmem [shape: f32[1,128], index: 6, kind: output, shape index: {1}]  }
   0x1   :  { %14 = vsyncpa [#allocation4 + $0x1], 0  ;;  %s758_s21 = smov 0   ;;  %s760_s22 = smov 0  }
   0x2   :  { %s762_s23 = smov 0   ;;  %s764_s24 = smov 0  }
   0x3 LB: > { %s779_s25 = sadd.s32 4294967295, %s718_s24   ;;  %s502_s26 = sadd.s32 4294967294, %s718_s24   ;;  %s718_s24 = sphi %s764_s24, %s1014_s24   ;;  %s714_s23 = sphi %s762_s23, %s1013_s23   ;;  %s710_s22 = sphi %s760_s22, %s1012_s22   ;;  %s706_s21 = sphi %s758_s21, %s1011_s21  }
   0x4   : > { %s783_s27 = sadd.s32 1, %s718_s24   ;;  %s137_s28 = sadd.s32 1, %s714_s23 }
   0x5   : > { %s134_s29 = ssub.s32 %s718_s24, %s783_s27  ;;  %p147_p0 = scmp.ne.s32.totalorder %s714_s23, %s710_s22 }
   0x6   : > { %p135_p1 = scmp.eq.s32.totalorder %s134_s29, 0  ;;  %p148_p2 = scmp.eq.s32.totalorder %s779_s25, 7 }
   0x7   : > { %p153_p3 = scmp.ne.s32.totalorder %s710_s22, %s706_s21  ;;  %p154_p4 = scmp.eq.s32.totalorder %s502_s26, 7 }
   0x8   : > { %s794_s30 = scalar_select %p135_p1, %s714_s23, %s137_s28  }
   0x9   : > { %p796_p5 = por %p148_p2, %p147_p0  ;;  %p800_p6 = por %p154_p4, %p153_p3 }
   0xa   : > { %p505_p7 = scmp.ge.s32.totalorder %s718_s24, 1  ;;  %p211_p8 = scmp.lt.s32.totalorder %s718_s24, 9 }
   0xc   : > { %p212_p9 = pnand %p505_p7, %p211_p8 }
   0xd   : > { %s234_s9 = sand.u32 (!%p212_p9), 1, %s710_s22   ;;  %p238_p10 = scmp.lt.s32.totalorder (!%p212_p9), %s779_s25, 7 }
   0xe   : > { %215 = sbr.rel (%p212_p9) target bundleno = 489 (0x1e9), region = 40  ;;  %s817_s14 = scalar_lea.vmem (!%p212_p9), [#allocation3], %s234_s9 }
   0xf   : > { %p506_p11 = scmp.ne.s32.totalorder (!%p212_p9), %s779_s25, 0 }
  0x13   : > { %s809_s10 = scalar_select %p238_p10, %s779_s25, 7 }
  0x14   : > { %244 = sbr.rel (%p506_p11) target bundleno = 27 (0x1b), region = 44 }
  0x15   : > { %s240_s13 = scalar_lea.vmem %s1002_s0, %s809_s10 }
  0x19   : > { %v245_v0 = vld [vmem:[%s1003_s1] sm:$0x1] }
  0x1a   : > { %246 = vst [vmem:[#allocation2] sm:$0x1] %v245_v0 }
  0x1b PF: > { %v264_v1 = vld [vmem:[%s1004_s2 + $0x78] sm:$0xff]  ;;  %v720_v2 = vmov 0.0   ;;  %v263_v3 = vld [vmem:[%s1004_s2 + $0x70] sm:$0xff]  ;;  %vm721_vm0 = vmmov 0   ;;  %v262_v4 = vld [vmem:[%s1004_s2 + $0x68] sm:$0xff]  ;;  %p507_p12 = scmp.ne.s32.totalorder %s779_s25, 7 }
  0x1c   : > { %545 = vmatprep.subr.mxu0 %v720_v2  ;;  %577 = vmatprep.mubr.msk.f32.mxu0 %vm721_vm0, %v720_v2  ;;  %v261_v5 = vld [vmem:[%s1004_s2 + $0x60] sm:$0xff]  ;;  %v353_v6 = vld [vmem:[%s1005_s3 + $0x78] sm:$0xff]  ;;  %v352_v7 = vld [vmem:[%s1005_s3 + $0x70] sm:$0xff] }
  0x1d   : > { %546 = vmatpush3.msra.mxu0 %v264_v1  ;;  %580 = vmatprep.subr.mxu1 %v720_v2  ;;  %v260_v8 = vld [vmem:[%s1004_s2 + $0x58] sm:$0xff]  ;;  %v351_v9 = vld [vmem:[%s1005_s3 + $0x68] sm:$0xff]  ;;  %v259_v10 = vld [vmem:[%s1004_s2 + $0x50] sm:$0xff] }
  0x1e   : > { %547 = vmatprep.subr.mxu0 %v720_v2  ;;  %612 = vmatprep.mubr.msk.f32.mxu1 %vm721_vm0, %v720_v2  ;;  %v350_v11 = vld [vmem:[%s1005_s3 + $0x60] sm:$0xff]  ;;  %v258_v12 = vld [vmem:[%s1004_s2 + $0x48] sm:$0xff]  ;;  %v349_v13 = vld [vmem:[%s1005_s3 + $0x58] sm:$0xff] }
  0x1f   : > { %548 = vmatpush3.msra.mxu0 %v263_v3  ;;  %581 = vmatpush3.msra.mxu1 %v353_v6  ;;  %v257_v14 = vld [vmem:[%s1004_s2 + $0x40] sm:$0xff]  ;;  %v348_v15 = vld [vmem:[%s1005_s3 + $0x50] sm:$0xff]  ;;  %v256_v16 = vld [vmem:[%s1004_s2 + $0x38] sm:$0xff] }
  0x20   : > { %549 = vmatprep.subr.mxu0 %v720_v2  ;;  %582 = vmatprep.subr.mxu1 %v720_v2  ;;  %v347_v17 = vld [vmem:[%s1005_s3 + $0x48] sm:$0xff]  ;;  %v255_v18 = vld [vmem:[%s1004_s2 + $0x30] sm:$0xff]  ;;  %v253_v20 = vld [vmem:[%s1004_s2 + $0x20] sm:$0xff] }
  0x21   : > { %550 = vmatpush3.msra.mxu0 %v262_v4  ;;  %583 = vmatpush3.msra.mxu1 %v352_v7  ;;  %v254_v19 = vld [vmem:[%s1004_s2 + $0x28] sm:$0xff]  ;;  %v252_v21 = vld [vmem:[%s1004_s2 + $0x18] sm:$0xff]  ;;  %v251_v22 = vld [vmem:[%s1004_s2 + $0x10] sm:$0xff] }
  0x22   : > { %551 = vmatprep.subr.mxu0 %v720_v2  ;;  %584 = vmatprep.subr.mxu1 %v720_v2  ;;  %v250_v23 = vld [vmem:[%s1004_s2 + $0x8] sm:$0xff]  ;;  %v249_v24 = vld [vmem:[%s1004_s2] sm:$0xff]  ;;  %v345_v27 = vld [vmem:[%s1005_s3 + $0x38] sm:$0xff] }
  0x23   : > { %552 = vmatpush3.msra.mxu0 %v261_v5  ;;  %585 = vmatpush3.msra.mxu1 %v351_v9  ;;  %v248_v25 = vld [vmem:[#allocation2] sm:$0x1]  ;;  %v344_v28 = vld [vmem:[%s1005_s3 + $0x30] sm:$0xff]  ;;  %v343_v29 = vld [vmem:[%s1005_s3 + $0x28] sm:$0xff] }
  0x24   : > { %553 = vmatprep.subr.mxu0 %v720_v2  ;;  %586 = vmatprep.subr.mxu1 %v720_v2  ;;  %v346_v26 = vld [vmem:[%s1005_s3 + $0x40] sm:$0xff]  ;;  %v341_v31 = vld [vmem:[%s1005_s3 + $0x18] sm:$0xff]  ;;  %v340_v32 = vld [vmem:[%s1005_s3 + $0x10] sm:$0xff] }
  0x25   : > { %554 = vmatpush3.msra.mxu0 %v260_v8  ;;  %587 = vmatpush3.msra.mxu1 %v350_v11  ;;  %v342_v30 = vld [vmem:[%s1005_s3 + $0x20] sm:$0xff]  ;;  %v339_v33 = vld [vmem:[%s1005_s3 + $0x8] sm:$0xff] }
  0x26   : > { %555 = vmatprep.subr.mxu0 %v720_v2  ;;  %588 = vmatprep.subr.mxu1 %v720_v2  ;;  %v338_v34 = vld [vmem:[%s1005_s3] sm:$0xff] }
  0x27   : > { %556 = vmatpush3.msra.mxu0 %v259_v10  ;;  %589 = vmatpush3.msra.mxu1 %v349_v13  ;;  %v247_v35 = vld [vmem:[%s240_s13] sm:$0x1] }
  0x28   : > { %557 = vmatprep.subr.mxu0 %v720_v2  ;;  %590 = vmatprep.subr.mxu1 %v720_v2  ;;  %v354_v40 = vld [vmem:[%s1006_s4] sm:$0x1] }
  0x29   : > { %558 = vmatpush3.msra.mxu0 %v258_v12  ;;  %591 = vmatpush3.msra.mxu1 %v348_v15 }
  0x2a   : > { %559 = vmatprep.subr.mxu0 %v720_v2  ;;  %592 = vmatprep.subr.mxu1 %v720_v2 }
  0x2b   : > { %560 = vmatpush3.msra.mxu0 %v257_v14  ;;  %593 = vmatpush3.msra.mxu1 %v347_v17 }
  0x2c   : > { %561 = vmatprep.subr.mxu0 %v720_v2  ;;  %594 = vmatprep.subr.mxu1 %v720_v2 }
  0x2d   : > { %562 = vmatpush3.msra.mxu0 %v256_v16  ;;  %595 = vmatpush3.msra.mxu1 %v346_v26 }
  0x2e   : > { %563 = vmatprep.subr.mxu0 %v720_v2  ;;  %596 = vmatprep.subr.mxu1 %v720_v2 }
  0x2f   : > { %564 = vmatpush3.msra.mxu0 %v255_v18  ;;  %597 = vmatpush3.msra.mxu1 %v345_v27 }
  0x30   : > { %565 = vmatprep.subr.mxu0 %v720_v2  ;;  %598 = vmatprep.subr.mxu1 %v720_v2 }
  0x31   : > { %566 = vmatpush3.msra.mxu0 %v254_v19  ;;  %599 = vmatpush3.msra.mxu1 %v344_v28 }
  0x32   : > { %567 = vmatprep.subr.mxu0 %v720_v2  ;;  %600 = vmatprep.subr.mxu1 %v720_v2 }
  0x33   : > { %568 = vmatpush3.msra.mxu0 %v253_v20  ;;  %601 = vmatpush3.msra.mxu1 %v343_v29 }
  0x34   : > { %569 = vmatprep.subr.mxu0 %v720_v2  ;;  %602 = vmatprep.subr.mxu1 %v720_v2 }
  0x35   : > { %570 = vmatpush3.msra.mxu0 %v252_v21  ;;  %603 = vmatpush3.msra.mxu1 %v342_v30 }
  0x36   : > { %571 = vmatprep.subr.mxu0 %v720_v2  ;;  %604 = vmatprep.subr.mxu1 %v720_v2 }
  0x37   : > { %572 = vmatpush3.msra.mxu0 %v251_v22  ;;  %605 = vmatpush3.msra.mxu1 %v341_v31 }
  0x38   : > { %573 = vmatprep.subr.mxu0 %v720_v2  ;;  %606 = vmatprep.subr.mxu1 %v720_v2 }
  0x39   : > { %574 = vmatpush3.msra.mxu0 %v250_v23  ;;  %607 = vmatpush3.msra.mxu1 %v340_v32 }
  0x3a   : > { %575 = vmatprep.subr.mxu0 %v720_v2  ;;  %608 = vmatprep.subr.mxu1 %v720_v2 }
  0x3b   : > { %576 = vmatpush3.msra.mxu0 %v249_v24  ;;  %609 = vmatpush3.msra.mxu1 %v339_v33 }
  0x3c   : > { %578 = vmatmul.mubr.f32.vlgmr.msra.gmra.mxu0 %v248_v25  ;;  %610 = vmatprep.subr.mxu1 %v720_v2 }
  0x3d   : > { %611 = vmatpush3.msra.mxu1 %v338_v34 }
  0xfc   : > { %v331_v36 = vpop.f32.mrf.mxu0 }
  0xfd   : > { %v335_v37 = vadd.f32 %v331_v36, %v247_v35 }
  0xfe   : > { %v579_v38 = vpop.f32.mrf.mxu0 }
  0xff   : > { %656 = vtanh.f32 %v335_v37 }
 0x10c   : > { %v657_v39 = vpop.eup %656 }
 0x10d   : > { %337 = vst [vmem:[#allocation2] sm:$0x1] %v657_v39  ;;  %613 = vmatmul.mubr.f32.vlgmr.msra.gmra.mxu1 %v657_v39 }
 0x1cc   : > { %429 = sbr.rel (%p507_p12) target bundleno = 466 (0x1d2), region = 48 }
 0x1cd   : > { %v421_v41 = vpop.f32.mrf.mxu1 }
 0x1ce   : > { %v422_v42 = vadd.f32 %v421_v41, %v354_v40 }
 0x1cf   : > { %v614_v43 = vpop.f32.mrf.mxu1 }
 0x1d0   : > { %425 = vst [vmem:[%s817_s14] sm:$0x1] %v422_v42 }
 0x1d1   : > { %430 = vst [vmem:[%s1008_s6] sm:$0x1] %v657_v39 }
 0x1d2 PF: > { %s508_s19 = sshll.u32 %s779_s25, 4  ;;  %s444_s29 = sshll.u32 %s817_s14, 4  ;;  %s445_s29 = int_to_ptr.vmem [resolvable:$true] %s444_s29 }
 0x1d3   : > { %s442_s28 = scalar_lea.hbm %s1007_s5, %s508_s19  ;;  %s432_s11 = scalar_lea.sflag [#allocation4], %s234_s9 }
 0x1d4   : > { %s658_s12 = scalar_lea.vmem %s445_s29, 16  ;;  %s722_s15 = smov [#allocation3]  }
 0x1d5   : > { %p659_p13 = scmp.ne.s32.totalorder %s445_s29, %s658_s12  ;;  %s662_s16 = sshll.u32 %s722_s15, 4  ;;  %s663_s16 = int_to_ptr.vmem [resolvable:$false] %s662_s16 }
 0x1d6   : > { %s664_s17 = scalar_lea.vmem %s663_s16, 32  ;;  %p665_p2 = scmp.lt.s32.totalorder %s445_s29, %s663_s16 }
 0x1d7   : > { %p660_p0 = pnand %p659_p13, %p796_p5  ;;  %p666_p3 = scmp.lt.s32.totalorder %s664_s17, %s658_s12 }
 0x1d9   : > { %p661_p1 = pneg %p660_p0  ;;  %p667_p4 = por %p666_p3, %p665_p2 }
 0x1db   : > { %p668_p7 = pnand %p667_p4, %p661_p1 }
 0x1dd   : > { %671 = shalt.err (!%p668_p7)
}
 0x1de   : > { %s672_s25 = scalar_lea.hbm %s442_s28, 16  ;;  %s676_s18 = scalar_lea.hbm %s1007_s5, 128 }
 0x1df   : > { %p673_p8 = scmp.ne.s32.totalorder %s442_s28, %s672_s25  ;;  %p677_p11 = scmp.lt.s32.totalorder %s442_s28, %s1007_s5 }
 0x1e0   : > { %p678_p12 = scmp.lt.s32.totalorder %s676_s18, %s672_s25 }
 0x1e1   : > { %p674_p9 = pnand %p673_p8, %p796_p5 }
 0x1e2   : > { %p679_p13 = por %p678_p12, %p677_p11 }
 0x1e3   : > { %p675_p10 = pneg %p674_p9 }
 0x1e5   : > { %p680_p0 = pnand %p679_p13, %p675_p10 }
 0x1e7   : > { %683 = shalt.err (!%p680_p0)
}
 0x1e8   : > { %615 = dma.vmem_to_hbm [thread:$0]  (%p796_p5), %s445_s29, 16, %s442_s28, %s432_s11  }
 0x1e9 PF: > { %p621_p1 = scmp.ge.s32.totalorder %s718_s24, 2  ;;  %s462_s19 = sand.u32 1, %s706_s21  }
 0x1ea   : > { %s463_s20 = scalar_lea.sflag [#allocation4], %s462_s19 }
 0x1eb   : > { %p618_p2 = pnand %p621_p1, %p800_p6 }
 0x1ed   : > { %p619_p3 = pneg %p618_p2 }
 0x1ef   : > { %701 = dma.done.wait (%p619_p3), %s463_s20, 16  }
 0x1f0   : > { %703 = vsyncadd (%p619_p3), %s463_s20, 4294967280  ;;  %p17_p4 = scmp.ge.s32.totalorder %s783_s27, 10   ;;  %s1011_s21 = smov %s710_s22 }
 0x1f1   : > { %s1012_s22 = smov %s714_s23  ;;  %s1013_s23 = smov %s794_s30 }
 0x1f2   : > { %s1014_s24 = smov %s783_s27  ;;  %19 = sbr.rel (!%p17_p4) target bundleno = 3 (0x3), region = 91 }
 0x1f7   :  { %467 = vsyncpa [#allocation4], 1 }
 0x1f8   :  { %469 = vsyncpa [#allocation4 + $0x1], 1 }

</bundles_post_ra>
